<compile_context>
chip_gen: v7x
topology: tpu7x:2x2x1
jax: 0.10.0
libtpu: 0.0.40
codegen_flags: <defaults>
</compile_context>

<pallas_src>
import functools

import numpy as np
import jax
import jax.numpy as jnp
from jax.experimental import pallas as pl
from jax.experimental.pallas import tpu as pltpu


def _round_up(n, m):
    return ((n + m - 1) // m) * m


# --------------------------------------------------------------------------
# Kernel: one batch tile through the whole network.
# --------------------------------------------------------------------------
def _dqn_kernel(x_ref, tconv_ref, cbias_ref, w1_ref, b1_ref,
                w2_ref, b2_ref, w3_ref, b3_ref, out_ref):
    """conv(as matmul)+bias+ReLU -> fused pool/flatten/fc1+ReLU -> fc2+ReLU -> fc3."""
    wdt = tconv_ref.dtype                        # weight compute dtype (bf16 or f32)
    x = x_ref[...]                               # (TB, input_dim) f32

    # Conv1d as one MXU matmul (zero padding + Toeplitz fold done on host).
    conv = jnp.dot(x.astype(wdt), tconv_ref[...],
                   preferred_element_type=jnp.float32)             # (TB, CLp)
    conv = jnp.maximum(conv + cbias_ref[...], 0.0)                 # bias + ReLU (f32)

    # AvgPool1d + channel-major Flatten + fc1 pre-folded into w1_ref.
    h1 = jnp.dot(conv.astype(wdt), w1_ref[...],
                 preferred_element_type=jnp.float32)
    h1 = jnp.maximum(h1 + b1_ref[...], 0.0)

    h2 = jnp.dot(h1.astype(wdt), w2_ref[...],
                 preferred_element_type=jnp.float32)
    h2 = jnp.maximum(h2 + b2_ref[...], 0.0)

    out = jnp.dot(h2.astype(wdt), w3_ref[...],
                  preferred_element_type=jnp.float32) + b3_ref[...]
    out_ref[...] = out.astype(out_ref.dtype)                       # lane-dense store


# --------------------------------------------------------------------------
# One-time host-side algebraic folding of the PyTorch-shaped parameters.
# --------------------------------------------------------------------------
def fold_params(params, *, input_dim, kernel_size=5, pad=2, pool_kernel=2,
                stride=1, weight_dtype=jnp.bfloat16):
    """Returns a dict of device arrays consumed by dqn_cnn_forward. Call once."""
    assert stride == 1, "kernel implements stride=1 (module default)"
    cw, cb, w1, b1, w2, b2, w3, b3 = [np.asarray(p, np.float32) for p in params]
    C, _, K = cw.shape
    n_action = w3.shape[0]
    L = (input_dim + 2 * pad - K) // stride + 1     # conv output length
    Lp = L // pool_kernel                           # pooled length (trailing rem dropped)
    CL = C * L
    CLp = _round_up(max(CL, 128), 128)              # lane-dense conv activation width
    H1 = w1.shape[0]                                # 256
    H2 = w2.shape[0]                                # 128

    # Conv1d as x @ Tconv:  Tpad[l+k, c*L+l] = cw[c,0,k]; pad rows dropped so the
    # kernel consumes x directly (no activation padding). Extra CLp-CL cols are 0.
    P = input_dim + 2 * pad
    Tpad = np.zeros((P, CLp), np.float32)
    ls = np.arange(L)
    for c in range(C):
        for k in range(K):
            Tpad[ls + k, c * L + ls] = cw[c, 0, k]
    tconv = Tpad[pad:pad + input_dim, :]                          # (input_dim, CLp)

    cbias = np.zeros((1, CLp), np.float32)
    cbias[0, :CL] = np.repeat(cb, L)                              # channel-major bias row

    # AvgPool1d + channel-major Flatten folded into fc1:
    #   W1f[c*L + pool*j + r, :] = w1.T[c*Lp + j, :] / pool   (r < pool)
    # rows past Lp*pool stay zero (PyTorch AvgPool drop-trailing), rows past CL too.
    w1t = w1.T.reshape(C, Lp, H1) / float(pool_kernel)
    w1f = np.zeros((C, L, H1), np.float32)
    w1f[:, :Lp * pool_kernel, :] = np.repeat(w1t, pool_kernel, axis=1)
    w1fp = np.zeros((CLp, H1), np.float32)
    w1fp[:CL, :] = w1f.reshape(CL, H1)

    w2t = w2.T                                                    # (H1, H2)

    # Lane-dense output: pad fc3 columns to a multiple of 128.
    n_pad = _round_up(max(n_action, 128), 128)
    w3p = np.zeros((H2, n_pad), np.float32)
    w3p[:, :n_action] = w3.T
    b3p = np.zeros((1, n_pad), np.float32)
    b3p[0, :n_action] = b3

    return {
        "tconv": jnp.asarray(tconv, weight_dtype),
        "cbias": jnp.asarray(cbias, jnp.float32),
        "w1": jnp.asarray(w1fp, weight_dtype),
        "b1": jnp.asarray(b1.reshape(1, H1), jnp.float32),
        "w2": jnp.asarray(w2t, weight_dtype),
        "b2": jnp.asarray(b2.reshape(1, H2), jnp.float32),
        "w3": jnp.asarray(w3p, weight_dtype),
        "b3": jnp.asarray(b3p, jnp.float32),
    }


# --------------------------------------------------------------------------
# Jitted forward: one pallas_call per invocation.
# --------------------------------------------------------------------------
@functools.partial(jax.jit, static_argnames=("n_action", "batch_tile"))
def dqn_cnn_forward(x, folded, *, n_action, batch_tile=256):
    """x: (B, input_dim) float32 (PyTorch input before unsqueeze(1)) -> (B, n_action)."""
    tconv, cbias = folded["tconv"], folded["cbias"]
    w1, b1 = folded["w1"], folded["b1"]
    w2, b2 = folded["w2"], folded["b2"]
    w3, b3 = folded["w3"], folded["b3"]

    B, input_dim = x.shape
    CLp = tconv.shape[1]
    H1 = w1.shape[1]
    H2 = w2.shape[1]
    n_pad = w3.shape[1]

    # Batch tile: tiny batches -> single full-array tile, no pad; otherwise split
    # into >=2 parallel 8-aligned tiles (keeps both v7x TensorCores busy), capped
    # by batch_tile (256 good on v6e/v7x, use 128 on v5e).
    if B <= 8:
        TB = B
    else:
        TB = _round_up(min(batch_tile, _round_up(B, 8)), 8)
        if B >= 16 and B <= TB:
            TB = _round_up(_round_up(B, 8) // 2, 8)
    B_pad = _round_up(B, TB)

    xp = x.astype(jnp.float32)
    if B_pad != B:
        xp = jnp.pad(xp, ((0, B_pad - B), (0, 0)))
    grid = (B_pad // TB,)

    weight_arrays = (tconv, cbias, w1, b1, w2, b2, w3, b3)
    weight_bytes = sum(int(a.size) * a.dtype.itemsize for a in weight_arrays)
    flops = 2 * B_pad * (input_dim * CLp + CLp * H1 + H1 * H2 + H2 * n_pad)
    bytes_accessed = B_pad * input_dim * 4 + weight_bytes + B_pad * n_pad * 4
    cost = pl.CostEstimate(flops=flops, transcendentals=0,
                           bytes_accessed=bytes_accessed)

    # VMEM budget: weights (double-buffered by the pipeline even though resident),
    # double-buffered x/out tiles, plus f32 activations; generous 2x margin, never
    # below the 32 MiB default, capped at v7x physical.
    act_bytes = 4 * TB * (CLp + H1 + H2 + n_pad)
    io_bytes = 2 * 4 * TB * (input_dim + n_pad)
    vmem_limit = min(64 * 1024 * 1024,
                     max(32 * 1024 * 1024,
                         2 * (2 * weight_bytes + io_bytes + act_bytes)))

    def w_spec(shape):
        # Whole-array block; constant block index => stays VMEM-resident across tiles.
        return pl.BlockSpec(shape, lambda i: (0, 0))

    out = pl.pallas_call(
        _dqn_kernel,
        out_shape=jax.ShapeDtypeStruct((B_pad, n_pad), jnp.float32),
        grid=grid,
        in_specs=[
            pl.BlockSpec((TB, input_dim), lambda i: (i, 0)),   # x batch tile
            w_spec((input_dim, CLp)),                          # Toeplitz conv matrix
            w_spec((1, CLp)),                                  # conv bias row
            w_spec((CLp, H1)),                                 # fused pool+flatten+fc1
            w_spec((1, H1)),                                   # fc1 bias
            w_spec((H1, H2)),                                  # fc2
            w_spec((1, H2)),                                   # fc2 bias
            w_spec((H2, n_pad)),                               # fc3 (lane-padded)
            w_spec((1, n_pad)),                                # fc3 bias (lane-padded)
        ],
        out_specs=pl.BlockSpec((TB, n_pad), lambda i: (i, 0)),
        compiler_params=pltpu.CompilerParams(
            dimension_semantics=("parallel",),
            vmem_limit_bytes=int(vmem_limit)),
        cost_estimate=cost,
    )(xp, tconv, cbias, w1, b1, w2, b2, w3, b3)

    return out[:B, :n_action]


# --------------------------------------------------------------------------
# Params + pure-JAX reference (mirrors the PyTorch forward).
# --------------------------------------------------------------------------
def init_params(key, input_dim, n_action, *, kernel_size=5, pad=2, pool_kernel=2, stride=1):
    """Deterministic PyTorch-shaped params (uniform +/- 1/sqrt(fan_in))."""
    C = n_action
    dim = ((input_dim - kernel_size + 2 * pad) // stride + 1) * C // pool_kernel
    ks = jax.random.split(key, 8)

    def u(k, shape, fan_in):
        bound = 1.0 / (fan_in ** 0.5)
        return jax.random.uniform(k, shape, jnp.float32, -bound, bound)

    cw = u(ks[0], (C, 1, kernel_size), kernel_size)
    cb = u(ks[1], (C,), kernel_size)
    w1 = u(ks[2], (256, dim), dim)
    b1 = u(ks[3], (256,), dim)
    w2 = u(ks[4], (128, 256), 256)
    b2 = u(ks[5], (128,), 256)
    w3 = u(ks[6], (n_action, 128), 128)
    b3 = u(ks[7], (n_action,), 128)
    return (cw, cb, w1, b1, w2, b2, w3, b3)


def reference_forward(x, params, *, pad=2, pool_kernel=2):
    """Pure-JAX mirror of the PyTorch forward (correctness check)."""
    cw, cb, w1, b1, w2, b2, w3, b3 = params
    B, input_dim = x.shape
    C, _, K = cw.shape
    L = input_dim + 2 * pad - K + 1
    Lp = L // pool_kernel
    xpad = jnp.pad(x, ((0, 0), (pad, pad)))
    conv = jnp.stack(
        [sum(cw[c, 0, k] * xpad[:, k:k + L] for k in range(K)) + cb[c] for c in range(C)],
        axis=1)                                                     # (B, C, L)
    conv = jnp.maximum(conv, 0.0)
    pooled = conv[:, :, :Lp * pool_kernel].reshape(B, C, Lp, pool_kernel).mean(-1)
    feat = pooled.reshape(B, C * Lp)                                # channel-major flatten
    h1 = jnp.maximum(feat @ w1.T + b1, 0.0)
    h2 = jnp.maximum(h1 @ w2.T + b2, 0.0)
    return h2 @ w3.T + b3


if __name__ == "__main__":
    B, input_dim, n_action = 2, 16, 4
    key = jax.random.PRNGKey(0)
    k_x, k_p, k_x2 = jax.random.split(key, 3)

    x = jax.random.normal(k_x, (B, input_dim), jnp.float32)
    params = init_params(k_p, input_dim, n_action)
    ref = reference_forward(x, params)

    # Default path: bf16 weights (MXU-native), f32 accumulation -> loose tolerance.
    folded_bf16 = fold_params(params, input_dim=input_dim)
    out = jax.block_until_ready(dqn_cnn_forward(x, folded_bf16, n_action=n_action))
    assert out.shape == (B, n_action), out.shape
    assert bool(jnp.allclose(out, ref, atol=5e-2, rtol=5e-2)), (out, ref)

    # f32 weights: exact-algebra check of the folds against the reference.
    folded_f32 = fold_params(params, input_dim=input_dim, weight_dtype=jnp.float32)
    out32 = jax.block_until_ready(dqn_cnn_forward(x, folded_f32, n_action=n_action))
    assert bool(jnp.allclose(out32, ref, atol=1e-4, rtol=1e-4)), (out32, ref)

    # Larger batch: exercises the >=2-tile parallel grid (v7x dual-TensorCore path).
    xb = jax.random.normal(k_x2, (32, input_dim), jnp.float32)
    refb = reference_forward(xb, params)
    outb = jax.block_until_ready(dqn_cnn_forward(xb, folded_f32, n_action=n_action))
    assert outb.shape == (32, n_action), outb.shape
    assert bool(jnp.allclose(outb, refb, atol=1e-4, rtol=1e-4)), (outb, refb)

    print("KERNEL_OK")
</pallas_src>

<mosaic_0001>
module attributes {stable_mosaic.version = 11 : i64} {
  func.func @_dqn_kernel(%arg0: i32, %arg1: memref<2x16xf32, #tpu.memory_space<vmem>>, %arg2: memref<16x128xbf16, #tpu.memory_space<vmem>>, %arg3: memref<1x128xf32, #tpu.memory_space<vmem>>, %arg4: memref<128x256xbf16, #tpu.memory_space<vmem>>, %arg5: memref<1x256xf32, #tpu.memory_space<vmem>>, %arg6: memref<256x128xbf16, #tpu.memory_space<vmem>>, %arg7: memref<1x128xf32, #tpu.memory_space<vmem>>, %arg8: memref<128x128xbf16, #tpu.memory_space<vmem>>, %arg9: memref<1x128xf32, #tpu.memory_space<vmem>>, %arg10: memref<2x128xf32, #tpu.memory_space<vmem>>) attributes {dimension_semantics = [#tpu.dimension_semantics<parallel>], iteration_bounds = array<i64: 1>, scalar_prefetch = 0 : i64, scratch_operands = 0 : i64, tpu.core_type = #tpu.core_type<tc>, window_params = [{transform_indices = @transform_0, window_bounds = array<i64: 2, 16>}, {pipeline_mode = #tpu.pipeline_mode<synchronous>, transform_indices = @transform_1, window_bounds = array<i64: 16, 128>}, {pipeline_mode = #tpu.pipeline_mode<synchronous>, transform_indices = @transform_2, window_bounds = array<i64: 1, 128>}, {pipeline_mode = #tpu.pipeline_mode<synchronous>, transform_indices = @transform_3, window_bounds = array<i64: 128, 256>}, {pipeline_mode = #tpu.pipeline_mode<synchronous>, transform_indices = @transform_4, window_bounds = array<i64: 1, 256>}, {pipeline_mode = #tpu.pipeline_mode<synchronous>, transform_indices = @transform_5, window_bounds = array<i64: 256, 128>}, {pipeline_mode = #tpu.pipeline_mode<synchronous>, transform_indices = @transform_6, window_bounds = array<i64: 1, 128>}, {pipeline_mode = #tpu.pipeline_mode<synchronous>, transform_indices = @transform_7, window_bounds = array<i64: 128, 128>}, {pipeline_mode = #tpu.pipeline_mode<synchronous>, transform_indices = @transform_8, window_bounds = array<i64: 1, 128>}, {transform_indices = @transform_9, window_bounds = array<i64: 2, 128>}]} {
    %c0 = arith.constant 0 : index
    %c0_0 = arith.constant 0 : index
    %0 = vector.load %arg1[%c0, %c0_0] : memref<2x16xf32, #tpu.memory_space<vmem>>, vector<2x16xf32>
    %1 = arith.truncf %0 : vector<2x16xf32> to vector<2x16xbf16>
    %c0_1 = arith.constant 0 : index
    %c0_2 = arith.constant 0 : index
    %2 = vector.load %arg2[%c0_1, %c0_2] : memref<16x128xbf16, #tpu.memory_space<vmem>>, vector<16x128xbf16>
    %cst = arith.constant dense<0.000000e+00> : vector<2x128xf32>
    %3 = tpu.matmul %1, %2, %cst {dimension_numbers = #tpu.dot_dimension_numbers<[1], [0], [0], [1], [0, 0, 1, 1], [], []>} : vector<2x16xbf16>, vector<16x128xbf16>, vector<2x128xf32> -> vector<2x128xf32>
    %c0_3 = arith.constant 0 : index
    %c0_4 = arith.constant 0 : index
    %4 = vector.load %arg3[%c0_3, %c0_4] : memref<1x128xf32, #tpu.memory_space<vmem>>, vector<1x128xf32>
    %5 = vector.broadcast %4 : vector<1x128xf32> to vector<2x128xf32>
    %6 = arith.addf %3, %5 : vector<2x128xf32>
    %cst_5 = arith.constant 0.000000e+00 : f32
    %7 = vector.broadcast %cst_5 : f32 to vector<2x128xf32>
    %8 = arith.maximumf %6, %7 : vector<2x128xf32>
    %9 = arith.truncf %8 : vector<2x128xf32> to vector<2x128xbf16>
    %c0_6 = arith.constant 0 : index
    %c0_7 = arith.constant 0 : index
    %10 = vector.load %arg4[%c0_6, %c0_7] : memref<128x256xbf16, #tpu.memory_space<vmem>>, vector<128x256xbf16>
    %cst_8 = arith.constant dense<0.000000e+00> : vector<2x256xf32>
    %11 = tpu.matmul %9, %10, %cst_8 {dimension_numbers = #tpu.dot_dimension_numbers<[1], [0], [0], [1], [0, 0, 1, 1], [], []>} : vector<2x128xbf16>, vector<128x256xbf16>, vector<2x256xf32> -> vector<2x256xf32>
    %c0_9 = arith.constant 0 : index
    %c0_10 = arith.constant 0 : index
    %12 = vector.load %arg5[%c0_9, %c0_10] : memref<1x256xf32, #tpu.memory_space<vmem>>, vector<1x256xf32>
    %13 = vector.broadcast %12 : vector<1x256xf32> to vector<2x256xf32>
    %14 = arith.addf %11, %13 : vector<2x256xf32>
    %cst_11 = arith.constant 0.000000e+00 : f32
    %15 = vector.broadcast %cst_11 : f32 to vector<2x256xf32>
    %16 = arith.maximumf %14, %15 : vector<2x256xf32>
    %17 = arith.truncf %16 : vector<2x256xf32> to vector<2x256xbf16>
    %c0_12 = arith.constant 0 : index
    %c0_13 = arith.constant 0 : index
    %18 = vector.load %arg6[%c0_12, %c0_13] : memref<256x128xbf16, #tpu.memory_space<vmem>>, vector<256x128xbf16>
    %cst_14 = arith.constant dense<0.000000e+00> : vector<2x128xf32>
    %19 = tpu.matmul %17, %18, %cst_14 {dimension_numbers = #tpu.dot_dimension_numbers<[1], [0], [0], [1], [0, 0, 1, 1], [], []>} : vector<2x256xbf16>, vector<256x128xbf16>, vector<2x128xf32> -> vector<2x128xf32>
    %c0_15 = arith.constant 0 : index
    %c0_16 = arith.constant 0 : index
    %20 = vector.load %arg7[%c0_15, %c0_16] : memref<1x128xf32, #tpu.memory_space<vmem>>, vector<1x128xf32>
    %21 = vector.broadcast %20 : vector<1x128xf32> to vector<2x128xf32>
    %22 = arith.addf %19, %21 : vector<2x128xf32>
    %cst_17 = arith.constant 0.000000e+00 : f32
    %23 = vector.broadcast %cst_17 : f32 to vector<2x128xf32>
    %24 = arith.maximumf %22, %23 : vector<2x128xf32>
    %25 = arith.truncf %24 : vector<2x128xf32> to vector<2x128xbf16>
    %c0_18 = arith.constant 0 : index
    %c0_19 = arith.constant 0 : index
    %26 = vector.load %arg8[%c0_18, %c0_19] : memref<128x128xbf16, #tpu.memory_space<vmem>>, vector<128x128xbf16>
    %cst_20 = arith.constant dense<0.000000e+00> : vector<2x128xf32>
    %27 = tpu.matmul %25, %26, %cst_20 {dimension_numbers = #tpu.dot_dimension_numbers<[1], [0], [0], [1], [0, 0, 1, 1], [], []>} : vector<2x128xbf16>, vector<128x128xbf16>, vector<2x128xf32> -> vector<2x128xf32>
    %c0_21 = arith.constant 0 : index
    %c0_22 = arith.constant 0 : index
    %28 = vector.load %arg9[%c0_21, %c0_22] : memref<1x128xf32, #tpu.memory_space<vmem>>, vector<1x128xf32>
    %29 = vector.broadcast %28 : vector<1x128xf32> to vector<2x128xf32>
    %30 = arith.addf %27, %29 : vector<2x128xf32>
    %c0_23 = arith.constant 0 : index
    %c0_24 = arith.constant 0 : index
    %31 = vector.load %arg10[%c0_23, %c0_24] : memref<2x128xf32, #tpu.memory_space<vmem>>, vector<2x128xf32>
    tpu.vector_store %arg10[%c0_23, %c0_24], %30 {strides = array<i32>} : memref<2x128xf32, #tpu.memory_space<vmem>>, vector<2x128xf32>,
    return
  }
  func.func @transform_0(%arg0: i32) -> (i32, i32) {
    %c0_i32 = arith.constant 0 : i32
    %c0_i32_0 = arith.constant 0 : i32
    return %arg0, %c0_i32 : i32, i32
  }
  func.func @transform_1(%arg0: i32) -> (i32, i32) {
    %c0_i32 = arith.constant 0 : i32
    %c0_i32_0 = arith.constant 0 : i32
    %c0_i32_1 = arith.constant 0 : i32
    return %c0_i32, %c0_i32_0 : i32, i32
  }
  func.func @transform_2(%arg0: i32) -> (i32, i32) {
    %c0_i32 = arith.constant 0 : i32
    %c0_i32_0 = arith.constant 0 : i32
    %c0_i32_1 = arith.constant 0 : i32
    return %c0_i32, %c0_i32_0 : i32, i32
  }
  func.func @transform_3(%arg0: i32) -> (i32, i32) {
    %c0_i32 = arith.constant 0 : i32
    %c0_i32_0 = arith.constant 0 : i32
    %c0_i32_1 = arith.constant 0 : i32
    return %c0_i32, %c0_i32_0 : i32, i32
  }
  func.func @transform_4(%arg0: i32) -> (i32, i32) {
    %c0_i32 = arith.constant 0 : i32
    %c0_i32_0 = arith.constant 0 : i32
    %c0_i32_1 = arith.constant 0 : i32
    return %c0_i32, %c0_i32_0 : i32, i32
  }
  func.func @transform_5(%arg0: i32) -> (i32, i32) {
    %c0_i32 = arith.constant 0 : i32
    %c0_i32_0 = arith.constant 0 : i32
    %c0_i32_1 = arith.constant 0 : i32
    return %c0_i32, %c0_i32_0 : i32, i32
  }
  func.func @transform_6(%arg0: i32) -> (i32, i32) {
    %c0_i32 = arith.constant 0 : i32
    %c0_i32_0 = arith.constant 0 : i32
    %c0_i32_1 = arith.constant 0 : i32
    return %c0_i32, %c0_i32_0 : i32, i32
  }
  func.func @transform_7(%arg0: i32) -> (i32, i32) {
    %c0_i32 = arith.constant 0 : i32
    %c0_i32_0 = arith.constant 0 : i32
    %c0_i32_1 = arith.constant 0 : i32
    return %c0_i32, %c0_i32_0 : i32, i32
  }
  func.func @transform_8(%arg0: i32) -> (i32, i32) {
    %c0_i32 = arith.constant 0 : i32
    %c0_i32_0 = arith.constant 0 : i32
    %c0_i32_1 = arith.constant 0 : i32
    return %c0_i32, %c0_i32_0 : i32, i32
  }
  func.func @transform_9(%arg0: i32) -> (i32, i32) {
    %c0_i32 = arith.constant 0 : i32
    %c0_i32_0 = arith.constant 0 : i32
    return %arg0, %c0_i32 : i32, i32
  }
}

</mosaic_0001>

<bundles_post_ra>
// kernel: dqn_cnn_forward.1
= control target key start
LH: loop header
LB: loop body
LE: loop exit
PB: predicated region body
PF: predicated region fallthrough
CT: control target
= control target key end

     0   :  { %14 = vsyncpa [#allocation3], 0  ;;  %s1042_s0 = inlined_call_operand.hbm [shape: f32[2,16], index: 0, kind: input, shape index: {}]   ;;  %s1043_s1 = inlined_call_operand.vmem [shape: bf16[16,128], index: 1, kind: input, shape index: {}]   ;;  %s1044_s2 = inlined_call_operand.vmem [shape: f32[1,128], index: 2, kind: input, shape index: {}]   ;;  %s1045_s3 = inlined_call_operand.hbm [shape: bf16[128,256], index: 3, kind: input, shape index: {}]   ;;  %s1046_s4 = inlined_call_operand.vmem [shape: f32[1,256], index: 4, kind: input, shape index: {}]   ;;  %s1047_s5 = inlined_call_operand.hbm [shape: bf16[256,128], index: 5, kind: input, shape index: {}]   ;;  %s1048_s6 = inlined_call_operand.vmem [shape: f32[1,128], index: 6, kind: input, shape index: {}]   ;;  %s1049_s7 = inlined_call_operand.hbm [shape: bf16[128,128], index: 7, kind: input, shape index: {}]   ;;  %s1050_s8 = inlined_call_operand.vmem [shape: f32[1,128], index: 8, kind: input, shape index: {}]   ;;  %s1051_s9 = inlined_call_operand.hbm [shape: f32[2,128], index: 9, kind: output, shape index: {}]  }
   0x1   :  { %15 = vsyncpa [#allocation6], 0 }
   0x2   :  { %16 = vsyncpa [#allocation9], 0 }
   0x3   :  { %17 = vsyncpa [#allocation4], 0  ;;  %s892_s30 = smov [#allocation5]   ;;  %s774_s13 = scalar_lea.hbm %s1045_s3, 2048 }
   0x4   :  { %s37_s10 = sshll.u32 %s892_s30, 4  ;;  %p775_p0 = scmp.ne.s32.totalorder %s1045_s3, %s774_s13  ;;  %s38_s10 = int_to_ptr.vmem [resolvable:$true] %s37_s10 }
   0x5   :  { %p778_p1 = scmp.lt.u32.totalorder %s774_s13, %s1045_s3 }
   0x7   :  { %p780_p2 = pnand %p778_p1, %p775_p0 }
   0x9   :  { %783 = shalt.err (!%p780_p2)
}
   0xa   :  { %s784_s18 = scalar_lea.vmem %s38_s10, 2048  ;;  %p789_p4 = scmp.lt.s32.totalorder %s38_s10, %s38_s10 }
   0xb   :  { %p785_p3 = scmp.ne.s32.totalorder %s38_s10, %s784_s18  ;;  %p790_p5 = scmp.lt.s32.totalorder %s784_s18, %s784_s18 }
   0xd   :  { %p791_p6 = por %p790_p5, %p789_p4 }
   0xf   :  { %p792_p7 = pnand %p791_p6, %p785_p3 }
  0x11   :  { %795 = shalt.err (!%p792_p7)
}
  0x12   :  { %s893_s19 = smov 128   ;;  %s894_s20 = smov 8  }
  0x13   :  { %43 = dma.hbm_to_vmem [thread:$0]  %s1045_s3, 2048, %s38_s10, [#allocation6], %s893_s19, %s893_s19, %s894_s20  }
  0x14   :  { %s895_s23 = smov [#allocation2]   ;;  %s896_s25 = smov [#allocation7]  }
  0x15   :  { %s24_s24 = sshll.u32 %s895_s23, 4  ;;  %s51_s26 = sshll.u32 %s896_s25, 4  ;;  %s25_s24 = int_to_ptr.vmem [resolvable:$true] %s24_s24  ;;  %s52_s26 = int_to_ptr.vmem [resolvable:$true] %s51_s26 }
  0x16   :  { %s796_s29 = scalar_lea.hbm %s1042_s0, 32 }
  0x17   :  { %p797_p8 = scmp.ne.s32.totalorder %s1042_s0, %s796_s29  ;;  %p800_p9 = scmp.lt.u32.totalorder %s796_s29, %s1042_s0 }
  0x19   :  { %p802_p10 = pnand %p800_p9, %p797_p8 }
  0x1b   :  { %805 = shalt.err (!%p802_p10)
}
  0x1c   :  { %s806_s3 = scalar_lea.vmem %s25_s24, 32  ;;  %p811_p12 = scmp.lt.s32.totalorder %s25_s24, %s25_s24 }
  0x1d   :  { %p807_p11 = scmp.ne.s32.totalorder %s25_s24, %s806_s3  ;;  %p812_p13 = scmp.lt.s32.totalorder %s806_s3, %s806_s3 }
  0x1f   :  { %p813_p0 = por %p812_p13, %p811_p12 }
  0x21   :  { %p814_p1 = pnand %p813_p0, %p807_p11 }
  0x23   :  { %817 = shalt.err (!%p814_p1)
}
  0x24   :  { %27 = dma.hbm_to_vmem [thread:$0]  %s1042_s0, 32, %s25_s24, [#allocation3]  }
  0x25   :  { %s818_s17 = scalar_lea.hbm %s1047_s5, 2048 }
  0x26   :  { %p819_p2 = scmp.ne.s32.totalorder %s1047_s5, %s818_s17  ;;  %p822_p3 = scmp.lt.u32.totalorder %s818_s17, %s1047_s5 }
  0x28   :  { %p824_p4 = pnand %p822_p3, %p819_p2 }
  0x2a   :  { %827 = shalt.err (!%p824_p4)
}
  0x2b   :  { %s828_s22 = scalar_lea.vmem %s52_s26, 2048  ;;  %p833_p6 = scmp.lt.s32.totalorder %s52_s26, %s52_s26 }
  0x2c   :  { %p829_p5 = scmp.ne.s32.totalorder %s52_s26, %s828_s22  ;;  %p834_p7 = scmp.lt.s32.totalorder %s828_s22, %s828_s22 }
  0x2e   :  { %p835_p8 = por %p834_p7, %p833_p6 }
  0x30   :  { %p836_p9 = pnand %p835_p8, %p829_p5 }
  0x32   :  { %839 = shalt.err (!%p836_p9)
}
  0x33   :  { %s897_s0 = smov 64   ;;  %s898_s23 = smov 4  }
  0x34   :  { %57 = dma.hbm_to_vmem [thread:$0]  %s1047_s5, 2048, %s52_s26, [#allocation6], %s897_s0, %s897_s0, %s898_s23  }
  0x35   :  { %s899_s27 = smov [#allocation8]   ;;  %s840_s11 = scalar_lea.hbm %s1049_s7, 1024 }
  0x36   :  { %s65_s28 = sshll.u32 %s899_s27, 4  ;;  %p841_p10 = scmp.ne.s32.totalorder %s1049_s7, %s840_s11  ;;  %s66_s28 = int_to_ptr.vmem [resolvable:$true] %s65_s28 }
  0x37   :  { %p844_p11 = scmp.lt.u32.totalorder %s840_s11, %s1049_s7 }
  0x39   :  { %p846_p12 = pnand %p844_p11, %p841_p10 }
  0x3b   :  { %849 = shalt.err (!%p846_p12)
}
  0x3c   :  { %s850_s14 = scalar_lea.vmem %s66_s28, 1024  ;;  %p855_p0 = scmp.lt.s32.totalorder %s66_s28, %s66_s28 }
  0x3d   :  { %p851_p13 = scmp.ne.s32.totalorder %s66_s28, %s850_s14  ;;  %p856_p1 = scmp.lt.s32.totalorder %s850_s14, %s850_s14 }
  0x3f   :  { %p857_p2 = por %p856_p1, %p855_p0 }
  0x41   :  { %p858_p3 = pnand %p857_p2, %p851_p13 }
  0x43   :  { %861 = shalt.err (!%p858_p3)
}
  0x44   :  { %71 = dma.hbm_to_vmem [thread:$0]  %s1049_s7, 1024, %s66_s28, [#allocation9], %s897_s0, %s897_s0, %s898_s23  }
  0x45   :  { %884 = dma.done.wait [#allocation3], 32  }
  0x46   :  { %885 = vsyncadd [#allocation3], 4294967264 }
  0x47   :  { %886 = dma.done.wait [#allocation6], 4096  }
  0x48   :  { %887 = vsyncadd [#allocation6], 4294963200 }
  0x49   :  { %888 = dma.done.wait [#allocation9], 1024  }
  0x4a   :  { %889 = vsyncadd [#allocation9], 4294966272  ;;  %v900_v0 = vmov 0.0   ;;  %vm901_vm0 = vmmov 0   ;;  %v725_v1 = vld [vmem:[%s1043_s1] sm:$0xff]   ;;  %vm104_vm1 = vcmask 130048   ;;  %v168_v51 = vlaneseq }
  0x4b   :  { %687 = vmatprep.subr.bf16.mxu0 %v900_v0  ;;  %689 = vmatprep.mubr.msk.bf16.mxu0 %vm901_vm0, %v900_v0  ;;  %v87_v2 = vld [vmem:[#allocation2] sm:$0x3]  ;;  %v726_v4 = vld [vmem:[#allocation5 + $0x4] ss:$8 sps:$4 sm:$0xff]   ;;  %v728_v5 = vld [vmem:[#allocation5] ss:$8 sps:$4 sm:$0xff]  }
  0x4c   :  { %688 = vmatpush3.bf16.msra.mxu0 %v725_v1  ;;  %v88_v3 = vpack.c.bf16 %v87_v2, %v87_v2  ;;  %v729_v6 = vld [vmem:[#allocation5 + $0x14] ss:$8 sps:$4 sm:$0xff]   ;;  %258 = vmatprep.subr.bf16.mxu1 %v726_v4  ;;  %v731_v7 = vld [vmem:[#allocation5 + $0x10] ss:$8 sps:$4 sm:$0xff]   ;;  %v732_v8 = vld [vmem:[#allocation5 + $0x24] ss:$8 sps:$4 sm:$0xff]  }
  0x4d   :  { %259 = vmatpush1.bf16.msra.mxu1 %v728_v5  ;;  %v734_v9 = vld [vmem:[#allocation5 + $0x20] ss:$8 sps:$4 sm:$0xff]   ;;  %v735_v10 = vld [vmem:[#allocation5 + $0x34] ss:$8 sps:$4 sm:$0xff]   ;;  %v737_v11 = vld [vmem:[#allocation5 + $0x30] ss:$8 sps:$4 sm:$0xff]  }
  0x4e   :  { %260 = vmatprep.subr.bf16.mxu1 %v729_v6  ;;  %v738_v12 = vld [vmem:[#allocation5 + $0x44] ss:$8 sps:$4 sm:$0xff]   ;;  %v740_v13 = vld [vmem:[#allocation5 + $0x40] ss:$8 sps:$4 sm:$0xff]   ;;  %v741_v14 = vld [vmem:[#allocation5 + $0x54] ss:$8 sps:$4 sm:$0xff]  }
  0x4f   :  { %690 = vmatmul.mubr.msk.bf16.vlgmr.msra.gmra.mrb[0].mxu0 %vm104_vm1, %v88_v3  ;;  %v743_v15 = vld [vmem:[#allocation5 + $0x50] ss:$8 sps:$4 sm:$0xff]   ;;  %v744_v16 = vld [vmem:[#allocation5 + $0x64] ss:$8 sps:$4 sm:$0xff]   ;;  %v746_v17 = vld [vmem:[#allocation5 + $0x60] ss:$8 sps:$4 sm:$0xff]  }
  0x50   :  { %v747_v18 = vld [vmem:[#allocation5 + $0x74] ss:$8 sps:$4 sm:$0xff]   ;;  %v749_v19 = vld [vmem:[#allocation5 + $0x70] ss:$8 sps:$4 sm:$0xff]   ;;  %v902_v20 = vmov 0   ;;  %v750_v21 = vld [vmem:[#allocation7 + $0x40] sm:$0xff]  }
  0x51   :  { %261 = vmatpush1.bf16.msra.mxu1 %v731_v7  ;;  %290 = vmatprep.mubr.bf16.mxu1 %v902_v20  ;;  %v751_v22 = vld [vmem:[#allocation7] sm:$0xff]   ;;  %v752_v23 = vld [vmem:[#allocation7 + $0x48] sm:$0xff]   ;;  %v754_v25 = vld [vmem:[#allocation7 + $0x50] sm:$0xff]   ;;  %v169_v52 = vshrl.u32 %v168_v51, 7  ;;  %s903_s21 = smov [#allocation10]  }
  0x52   :  { %262 = vmatprep.subr.bf16.mxu1 %v732_v8  ;;  %656 = vmatprep.subr.bf16.mxu0 %v750_v21  ;;  %v753_v24 = vld [vmem:[#allocation7 + $0x8] sm:$0xff]   ;;  %v755_v26 = vld [vmem:[#allocation7 + $0x10] sm:$0xff]   ;;  %v756_v27 = vld [vmem:[#allocation7 + $0x58] sm:$0xff]   ;;  %s598_s22 = sshll.u32 %s903_s21, 4  ;;  %s599_s22 = int_to_ptr.vmem [resolvable:$true] %s598_s22 }
  0x53   :  { %657 = vmatpush3.bf16.msra.mxu0 %v751_v22  ;;  %v757_v28 = vld [vmem:[#allocation7 + $0x18] sm:$0xff]   ;;  %v758_v29 = vld [vmem:[#allocation7 + $0x60] sm:$0xff]   ;;  %v760_v31 = vld [vmem:[#allocation7 + $0x68] sm:$0xff]   ;;  %v170_v53 = vsub.s32 0, %v169_v52  ;;  %v174_v55 = vsub.s32 1, %v169_v52  ;;  %p867_p5 = scmp.lt.s32.totalorder %s599_s22, %s599_s22 }
  0x54   :  { %658 = vmatprep.subr.bf16.mxu0 %v752_v23  ;;  %v759_v30 = vld [vmem:[#allocation7 + $0x20] sm:$0xff]   ;;  %v761_v32 = vld [vmem:[#allocation7 + $0x28] sm:$0xff]   ;;  %v609_v33 = vld [vmem:[%s1044_s2] ss:$0 sm:$0xff] }
  0x55   :  { %263 = vmatpush1.bf16.msra.mxu1 %v734_v9  ;;  %v762_v41 = vld [vmem:[#allocation7 + $0x70] sm:$0xff]   ;;  %v764_v43 = vld [vmem:[#allocation7 + $0x78] sm:$0xff]   ;;  %v766_v45 = vld [vmem:[#allocation8] sm:$0xff]  }
  0x56   :  { %264 = vmatprep.subr.bf16.mxu1 %v735_v10  ;;  %v763_v42 = vld [vmem:[#allocation7 + $0x30] sm:$0xff]   ;;  %v765_v44 = vld [vmem:[#allocation7 + $0x38] sm:$0xff]   ;;  %v767_v46 = vld [vmem:[#allocation8 + $0x8] sm:$0xff]  }
  0x57   :  { %659 = vmatpush3.bf16.msra.mxu0 %v753_v24  ;;  %v768_v47 = vld [vmem:[#allocation8 + $0x10] sm:$0xff]   ;;  %v769_v48 = vld [vmem:[#allocation8 + $0x18] sm:$0xff]   ;;  %v770_v49 = vld [vmem:[#allocation8 + $0x20] sm:$0xff]  }
  0x58   :  { %660 = vmatprep.subr.bf16.mxu0 %v754_v25  ;;  %v771_v50 = vld [vmem:[#allocation8 + $0x28] sm:$0xff]   ;;  %v166_v54 = vld [vmem:[%s1046_s4] sm:$0x3]  ;;  %v773_v6 = vld [vmem:[#allocation8 + $0x38] sm:$0xff]  }
  0x59   :  { %265 = vmatpush1.bf16.msra.mxu1 %v737_v11  ;;  %v171_v56 = vrot.slane %v166_v54, %v170_v53  ;;  %v175_v57 = vrot.slane %v166_v54, %v174_v55  ;;  %v772_v5 = vld [vmem:[#allocation8 + $0x30] sm:$0xff]  }
  0x5a   :  { %266 = vmatprep.subr.bf16.mxu1 %v738_v12  ;;  %v628_v8 = vld [vmem:[%s1048_s6] ss:$0 sm:$0xff]  ;;  %s862_s6 = scalar_lea.vmem %s599_s22, 32 }
  0x5b   :  { %661 = vmatpush3.bf16.msra.mxu0 %v755_v26  ;;  %p863_p4 = scmp.ne.s32.totalorder %s599_s22, %s862_s6  ;;  %p868_p6 = scmp.lt.s32.totalorder %s862_s6, %s862_s6 }
  0x5c   :  { %662 = vmatprep.subr.bf16.mxu0 %v756_v27 }
  0x5d   :  { %267 = vmatpush1.bf16.msra.mxu1 %v740_v13  ;;  %p869_p7 = por %p868_p6, %p867_p5 }
  0x5e   :  { %268 = vmatprep.subr.bf16.mxu1 %v741_v14 }
  0x5f   :  { %663 = vmatpush3.bf16.msra.mxu0 %v757_v28  ;;  %p870_p8 = pnand %p869_p7, %p863_p4 }
  0x60   :  { %664 = vmatprep.subr.bf16.mxu0 %v758_v29 }
  0x61   :  { %269 = vmatpush1.bf16.msra.mxu1 %v743_v15 }
  0x62   :  { %270 = vmatprep.subr.bf16.mxu1 %v744_v16  ;;  %v645_v16 = vld [vmem:[%s1050_s8] ss:$0 sm:$0xff] }
  0x63   :  { %665 = vmatpush3.bf16.msra.mxu0 %v759_v30 }
  0x64   :  { %666 = vmatprep.subr.bf16.mxu0 %v760_v31 }
  0x65   :  { %271 = vmatpush1.bf16.msra.mxu1 %v746_v17 }
  0x66   :  { %272 = vmatprep.subr.bf16.mxu1 %v747_v18 }
  0x67   :  { %667 = vmatpush3.bf16.msra.mxu0 %v761_v32 }
  0x68   :  { %668 = vmatprep.subr.bf16.mxu0 %v762_v41 }
  0x69   :  { %273 = vmatpush1.bf16.msra.mxu1 %v749_v19 }
  0x6a   :  { %693 = vmatprep.subr.bf16.mxu1 %v900_v0 }
  0x6b   :  { %669 = vmatpush3.bf16.msra.mxu0 %v763_v42 }
  0x6c   :  { %670 = vmatprep.subr.bf16.mxu0 %v764_v43 }
  0x6f   :  { %671 = vmatpush3.bf16.msra.mxu0 %v765_v44 }
 0x122   :  { %v142_v34 = vpop.f32.mrb[0].mxu0 }
 0x123   :  { %v143_v35 = vadd.f32 %v609_v33, %v142_v34  ;;  %v691_v36 = vpop.f32.mrb[1].mxu0 }
 0x124   :  { %v145_v37 = vpop.f32.mrb[2].mxu0 }
 0x125   :  { %v148_v38 = vmax.f32 %v143_v35, 0.0  ;;  %v692_v39 = vpop.f32.mrb[3].mxu0 }
 0x127   :  { %v149_v40 = vpack.c.bf16 %v148_v38, %v148_v38 }
 0x129   :  { %291 = vmatmul.mubr.bf16.vlgmr.msra.gmra.mrb[0].mxu1 %v149_v40 }
 0x12a   :  { %709 = vmatprep.mubr.msk.bf16.mxu1 %vm901_vm0, %v900_v0  ;;  %694 = vmatpush3.bf16.msra.mxu1 %v766_v45 }
 0x12b   :  { %695 = vmatprep.subr.bf16.mxu1 %v900_v0 }
 0x12e   :  { %696 = vmatpush3.bf16.msra.mxu1 %v767_v46 }
 0x12f   :  { %697 = vmatprep.subr.bf16.mxu1 %v900_v0 }
 0x132   :  { %698 = vmatpush3.bf16.msra.mxu1 %v768_v47 }
 0x133   :  { %699 = vmatprep.subr.bf16.mxu1 %v900_v0 }
 0x136   :  { %700 = vmatpush3.bf16.msra.mxu1 %v769_v48 }
 0x137   :  { %701 = vmatprep.subr.bf16.mxu1 %v900_v0 }
 0x13a   :  { %702 = vmatpush3.bf16.msra.mxu1 %v770_v49 }
 0x13b   :  { %703 = vmatprep.subr.bf16.mxu1 %v900_v0 }
 0x13e   :  { %704 = vmatpush3.bf16.msra.mxu1 %v771_v50 }
 0x13f   :  { %705 = vmatprep.subr.bf16.mxu1 %v900_v0 }
 0x142   :  { %706 = vmatpush3.bf16.msra.mxu1 %v772_v5 }
 0x143   :  { %707 = vmatprep.subr.bf16.mxu1 %v900_v0 }
 0x146   :  { %708 = vmatpush3.bf16.msra.mxu1 %v773_v6 }
 0x1fc   :  { %v292_v58 = vpop.f32.mrb[0].mxu1 }
 0x1fd   :  { %v293_v59 = vadd.f32 %v292_v58, %v171_v56  ;;  %v294_v60 = vpop.f32.mrb[1].mxu1 }
 0x1fe   :  { %v295_v61 = vadd.f32 %v294_v60, %v175_v57  ;;  %v296_v62 = vpop.f32.mrb[2].mxu1 }
 0x1ff   :  { %v299_v63 = vmax.f32 %v293_v59, 0.0  ;;  %v297_v1 = vpop.f32.mrb[3].mxu1 }
 0x200   :  { %v300_v2 = vmax.f32 %v295_v61, 0.0 }
 0x201   :  { %v301_v4 = vpack.c.bf16 %v299_v63, %v299_v63 }
 0x202   :  { %v302_v3 = vpack.c.bf16 %v300_v2, %v300_v2 }
 0x204   :  { %470 = vmatprep.mubr.bf16.mxu0 %v302_v3 }
 0x205   :  { %471 = vmatmul.mubr.bf16.vlgmr.msra.gmra.mrb[4].mxu0 %v301_v4 }
 0x2d8   :  { %v672_v7 = vpop.f32.mrb[4].mxu0 }
 0x2d9   :  { %v673_v9 = vpop.f32.mrb[5].mxu0 }
 0x2da   :  { %v674_v10 = vadd.f32 %v673_v9, %v672_v7  ;;  %v675_v11 = vpop.f32.mrb[6].mxu0 }
 0x2db   :  { %v676_v12 = vpop.f32.mrb[7].mxu0 }
 0x2dc   :  { %v473_v13 = vadd.f32 %v674_v10, %v628_v8 }
 0x2de   :  { %v478_v14 = vmax.f32 %v473_v13, 0.0 }
 0x2e0   :  { %v479_v15 = vpack.c.bf16 %v478_v14, %v478_v14 }
 0x2e2   :  { %710 = vmatmul.mubr.bf16.vlgmr.msra.gmra.mrb[4].mxu1 %v479_v15 }
 0x3b5   :  { %v585_v0 = vpop.f32.mrb[4].mxu1 }
 0x3b6   :  { %v586_v17 = vadd.f32 %v645_v16, %v585_v0  ;;  %v711_v18 = vpop.f32.mrb[5].mxu1 }
 0x3b7   :  { %v588_v19 = vpop.f32.mrb[6].mxu1 }
 0x3b8   :  { %591 = vst [vmem:[#allocation10] sm:$0x3] %v586_v17  ;;  %v712_v20 = vpop.f32.mrb[7].mxu1 }
 0x3b9   :  { %873 = shalt.err (!%p870_p8)
}
 0x3ba   :  { %s874_s8 = scalar_lea.hbm %s1051_s9, 32 }
 0x3bb   :  { %p875_p9 = scmp.ne.s32.totalorder %s1051_s9, %s874_s8  ;;  %p878_p10 = scmp.lt.u32.totalorder %s874_s8, %s1051_s9 }
 0x3bd   :  { %p880_p11 = pnand %p878_p10, %p875_p9 }
 0x3bf   :  { %883 = shalt.err (!%p880_p11)
}
 0x3c0   :  { %601 = dma.vmem_to_hbm [thread:$0]  %s599_s22, 32, %s1051_s9, [#allocation4]  }
 0x3c1   :  { %890 = dma.done.wait [#allocation4], 32  }
 0x3c2   :  { %891 = vsyncadd [#allocation4], 4294967264 }
 0x3c3   :  { %605 = vsyncpa [#allocation3], 1 }
 0x3c4   :  { %606 = vsyncpa [#allocation6], 1 }
 0x3c5   :  { %607 = vsyncpa [#allocation9], 1 }
 0x3c6   :  { %608 = vsyncpa [#allocation4], 1 }

</bundles_post_ra>
